<compile_context>
chip_gen: v5e
topology: v5e:2x2
jax: 0.10.0
libtpu: 0.0.40
codegen_flags: <defaults>
</compile_context>

<pallas_src>
import functools

import jax
import jax.numpy as jnp
import numpy as np
from jax import lax
from jax.experimental import pallas as pl
from jax.experimental.pallas import tpu as pltpu


def _round_up(x, m):
    return (x + m - 1) // m * m


def _num_tensorcores_per_chip():
    """Best-effort detection of multi-TensorCore chips (v7x). Defaults to 1."""
    try:
        kind = (getattr(jax.devices()[0], "device_kind", "") or "").lower()
        if "v7" in kind or "7x" in kind:
            return 2
    except Exception:
        pass
    return 1


def _quant_vox_kernel(xy_ref, xyq_ref, vox_ref, acc_ref, *, H, W, TB, CPB, scale):
    """Grid = (G, CPB): batch groups x event chunks.

    xy_ref  : (TB, 2, CHUNK) float32  lane-dense events of batch group g, chunk c
    xyq_ref : (TB, 2, CHUNK) int32    quantized coordinates (same layout)
    vox_ref : (1, TB*H, W)   int32    histogram block for batch group g
    acc_ref : (TB*H, W)      float32  accumulator, persists across c
    """
    c = pl.program_id(1)

    @pl.when(c == 0)
    def _init():
        acc_ref[...] = jnp.zeros_like(acc_ref)

    # Quantization of the whole block: truncation toward zero matches torch .int()
    # for the normalized [0, 1] inputs this layer expects.  Lane-dense store.
    xyq_ref[...] = (xy_ref[...] * scale).astype(jnp.int32)

    row_ids = lax.broadcasted_iota(jnp.int32, (H, 1), 0)
    col_ids = lax.broadcasted_iota(jnp.int32, (W, 1), 0)

    def body(t, carry):
        q = (xy_ref[t] * scale).astype(jnp.int32)          # (2, CHUNK)
        x = q[0:1, :]                                       # (1, K) column index
        y = q[1:2, :]                                       # (1, K) row index
        # Padded events were filled with -1.0 -> negative indices -> no match.
        y_oh = (row_ids == y).astype(jnp.bfloat16)          # (H, K), events on lanes
        x_oh = (col_ids == x).astype(jnp.bfloat16)          # (W, K), events on lanes
        # (H, K) @ (W, K)^T -> (H, W) on the MXU, f32 accumulate (exact counts).
        # Contracting (1,)x(1,) is the native "A @ B^T" form (flash-attn style),
        # so no RHS relayout is materialized.
        part = lax.dot_general(
            y_oh, x_oh,
            dimension_numbers=(((1,), (1,)), ((), ())),
            preferred_element_type=jnp.float32)
        off = t * H
        if H % 8 == 0:
            off = pl.multiple_of(off, 8)
        acc_ref[pl.ds(off, H), :] += part                   # slab accumulate
        return carry

    lax.fori_loop(0, TB, body, 0)

    @pl.when(c == CPB - 1)
    def _finalize():
        vox_ref[0, :, :] = acc_ref[...].astype(jnp.int32)


def quantization_layer(xy, dim=(16, 16), *, chunk_target=8192, row_target=256):
    """Pallas equivalent of QuantizationLayer.forward.

    xy : (B, N, 2) float32 normalized to [0, 1];  dim = (W, H).
    Returns (xy_quantized int32 (B, N, 2), vox int32 (B, H, W)).
    """
    W, H = dim
    B, N, C = xy.shape
    assert C == 2, "QuantizationLayer expects (x, y) channel pairs"
    scale = float(min(W, H) - 1)

    # ---- tiling choices ---------------------------------------------------
    # Fold up to row_target//H batch elements into each grid step (they share one
    # (TB*H, W) accumulator slab).  Only on multi-TC chips (v7x) keep >= 2 batch
    # groups so the 'parallel' g axis can be sharded across cores.
    TB = max(1, min(row_target // max(H, 1), B))
    if _num_tensorcores_per_chip() >= 2 and B >= 2:
        TB = max(1, min(TB, B // 2))
    B_pad = _round_up(B, TB)
    G = B_pad // TB

    # Event chunk size: as large as fits a conservative VMEM budget.
    # in + xyq-out blocks, double-buffered, sublane dim 2 padded to 8 by tiling:
    #   bytes ~ 2(io) * 2(dbuf) * TB * 8 * CHUNK * 4
    CHUNK = min(_round_up(max(N, 1), 128), _round_up(chunk_target, 128))
    budget = 20 * 1024 * 1024
    while CHUNK > 128 and 2 * 2 * TB * 8 * CHUNK * 4 > budget:
        CHUNK //= 2
    CHUNK = max(128, _round_up(CHUNK, 128))
    N_pad = _round_up(max(N, 1), CHUNK)
    CPB = N_pad // CHUNK
    TBH = TB * H

    # ---- lane-dense layout: one fused transpose+pad pass; pad events with -1 ----
    xy_t = jnp.pad(jnp.transpose(xy, (0, 2, 1)),
                   ((0, B_pad - B), (0, 0), (0, N_pad - N)),
                   constant_values=-1.0)

    kernel = functools.partial(_quant_vox_kernel, H=H, W=W, TB=TB, CPB=CPB,
                               scale=scale)
    cost = pl.CostEstimate(
        flops=2 * H * W * B_pad * N_pad,
        transcendentals=0,
        bytes_accessed=16 * B_pad * N_pad + 4 * B_pad * H * W)

    xyq_t, vox_p = pl.pallas_call(
        kernel,
        out_shape=(
            jax.ShapeDtypeStruct((B_pad, 2, N_pad), jnp.int32),
            jax.ShapeDtypeStruct((G, TBH, W), jnp.int32),
        ),
        grid=(G, CPB),
        in_specs=[pl.BlockSpec((TB, 2, CHUNK), lambda g, c: (g, 0, c))],
        out_specs=(
            pl.BlockSpec((TB, 2, CHUNK), lambda g, c: (g, 0, c)),
            pl.BlockSpec((1, TBH, W), lambda g, c: (g, 0, 0)),
        ),
        scratch_shapes=[pltpu.VMEM((TBH, W), jnp.float32)],
        compiler_params=pltpu.CompilerParams(
            dimension_semantics=("parallel", "arbitrary"),
            vmem_limit_bytes=32 * 1024 * 1024),
        cost_estimate=cost,
    )(xy_t)

    # ---- back to the PyTorch layout (single fused slice+transpose) ----------
    xyq = jnp.transpose(xyq_t[:B, :, :N], (0, 2, 1))          # (B, N, 2)
    vox = vox_p.reshape(B_pad, H, W)[:B]                       # (B, H, W)
    return xyq, vox


def _reference(xy_np, dim):
    """Pure-numpy reimplementation of the PyTorch forward."""
    W, H = dim
    B, N, C = xy_np.shape
    xyq = (xy_np * (min(dim) - 1)).astype(np.int32)            # trunc toward zero
    x = xyq[:, :, 0].reshape(-1).astype(np.int64)
    y = xyq[:, :, 1].reshape(-1).astype(np.int64)
    b = np.repeat(np.arange(B, dtype=np.int64), N)
    vox = np.zeros(H * W * B, dtype=np.int32)
    idx = x + W * y + W * H * b
    np.add.at(vox, idx, 1)
    return xyq, vox.reshape(-1, H, W)


def _check(B, N, dim, seed):
    key = jax.random.PRNGKey(seed)
    xy = jax.random.uniform(key, (B, N, 2), dtype=jnp.float32)
    xyq, vox = quantization_layer(xy, dim=dim)
    jax.block_until_ready((xyq, vox))
    ref_xyq, ref_vox = _reference(np.asarray(xy), dim)
    W, H = dim
    assert xyq.shape == (B, N, 2) and xyq.dtype == jnp.int32
    assert vox.shape == (B, H, W) and vox.dtype == jnp.int32
    np.testing.assert_array_equal(np.asarray(xyq), ref_xyq)
    np.testing.assert_array_equal(np.asarray(vox), ref_vox)


if __name__ == "__main__":
    # Small config matching the module usage.
    _check(B=2, N=8, dim=(16, 16), seed=0)
    # Stress config: batch folding (TB>1), batch/event padding, non-square dim.
    _check(B=5, N=2500, dim=(32, 16), seed=0)
    print("KERNEL_OK")
</pallas_src>

<mosaic_0001>
module attributes {stable_mosaic.version = 11 : i64} {
  func.func @_quant_vox_kernel(%arg0: i32, %arg1: i32, %arg2: memref<2x2x128xf32, #tpu.memory_space<vmem>>, %arg3: memref<2x2x128xi32, #tpu.memory_space<vmem>>, %arg4: memref<1x32x16xi32, #tpu.memory_space<vmem>>, %arg5: memref<32x16xf32, #tpu.memory_space<vmem>>) attributes {dimension_semantics = [#tpu.dimension_semantics<parallel>, #tpu.dimension_semantics<arbitrary>], iteration_bounds = array<i64: 1, 1>, scalar_prefetch = 0 : i64, scratch_operands = 1 : i64, tpu.core_type = #tpu.core_type<tc>, window_params = [{transform_indices = @transform_0, window_bounds = array<i64: 2, 2, 128>}, {transform_indices = @transform_1, window_bounds = array<i64: 2, 2, 128>}, {transform_indices = @transform_2, window_bounds = array<i64: 1, 32, 16>}]} {
    %c0_i32 = arith.constant 0 : i32
    %0 = arith.cmpi eq, %arg1, %c0_i32 : i32
    %1 = arith.extui %0 : i1 to i32
    %c0_i32_0 = arith.constant 0 : i32
    %2 = arith.cmpi ne, %1, %c0_i32_0 : i32
    scf.if %2 {
      %cst_10 = arith.constant 0.000000e+00 : f32
      %14 = vector.broadcast %cst_10 : f32 to vector<32x16xf32>
      %c0_11 = arith.constant 0 : index
      %c0_12 = arith.constant 0 : index
      %15 = vector.load %arg5[%c0_11, %c0_12] : memref<32x16xf32, #tpu.memory_space<vmem>>, vector<32x16xf32>
      tpu.vector_store %arg5[%c0_11, %c0_12], %14 {strides = array<i32>} : memref<32x16xf32, #tpu.memory_space<vmem>>, vector<32x16xf32>,
    } else {
    }
    %c0 = arith.constant 0 : index
    %c0_1 = arith.constant 0 : index
    %c0_2 = arith.constant 0 : index
    %3 = vector.load %arg2[%c0, %c0_1, %c0_2] : memref<2x2x128xf32, #tpu.memory_space<vmem>>, vector<2x2x128xf32>
    %cst = arith.constant 1.500000e+01 : f32
    %4 = vector.broadcast %cst : f32 to vector<2x2x128xf32>
    %5 = arith.mulf %3, %4 : vector<2x2x128xf32>
    %6 = arith.fptosi %5 : vector<2x2x128xf32> to vector<2x2x128xi32>
    %c0_3 = arith.constant 0 : index
    %c0_4 = arith.constant 0 : index
    %c0_5 = arith.constant 0 : index
    %7 = vector.load %arg3[%c0_3, %c0_4, %c0_5] : memref<2x2x128xi32, #tpu.memory_space<vmem>>, vector<2x2x128xi32>
    tpu.vector_store %arg3[%c0_3, %c0_4, %c0_5], %6 {strides = array<i32>} : memref<2x2x128xi32, #tpu.memory_space<vmem>>, vector<2x2x128xi32>,
    %8 = tpu.iota {dimensions = array<i32: 0>} : vector<16x1xi32>
    %9 = tpu.iota {dimensions = array<i32: 0>} : vector<16x1xi32>
    %c0_i32_6 = arith.constant 0 : i32
    %c2_i32 = arith.constant 2 : i32
    %10 = arith.addi %c0_i32_6, %c2_i32 : i32
    %c1_i32 = arith.constant 1 : i32
    scf.for %arg6 = %c0_i32_6 to %10 step %c1_i32  : i32 {
      %14 = arith.index_cast %arg6 : i32 to index
      %c0_10 = arith.constant 0 : index
      %c0_11 = arith.constant 0 : index
      %15 = vector.load %arg2[%14, %c0_10, %c0_11] : memref<2x2x128xf32, #tpu.memory_space<vmem>>, vector<1x2x128xf32>
      %16 = vector.shape_cast %15 : vector<1x2x128xf32> to vector<2x128xf32>
      %cst_12 = arith.constant 1.500000e+01 : f32
      %17 = vector.broadcast %cst_12 : f32 to vector<2x128xf32>
      %18 = arith.mulf %16, %17 : vector<2x128xf32>
      %19 = arith.fptosi %18 : vector<2x128xf32> to vector<2x128xi32>
      %20 = vector.extract_strided_slice %19 {offsets = [0, 0], sizes = [1, 128], strides = [1, 1]} : vector<2x128xi32> to vector<1x128xi32>
      %21 = vector.extract_strided_slice %19 {offsets = [1, 0], sizes = [1, 128], strides = [1, 1]} : vector<2x128xi32> to vector<1x128xi32>
      %22 = vector.broadcast %8 : vector<16x1xi32> to vector<16x128xi32>
      %23 = vector.broadcast %21 : vector<1x128xi32> to vector<16x128xi32>
      %24 = arith.cmpi eq, %22, %23 : vector<16x128xi32>
      %25 = arith.extui %24 : vector<16x128xi1> to vector<16x128xi32>
      %26 = arith.sitofp %25 : vector<16x128xi32> to vector<16x128xf32>
      %27 = arith.truncf %26 : vector<16x128xf32> to vector<16x128xbf16>
      %28 = vector.broadcast %9 : vector<16x1xi32> to vector<16x128xi32>
      %29 = vector.broadcast %20 : vector<1x128xi32> to vector<16x128xi32>
      %30 = arith.cmpi eq, %28, %29 : vector<16x128xi32>
      %31 = arith.extui %30 : vector<16x128xi1> to vector<16x128xi32>
      %32 = arith.sitofp %31 : vector<16x128xi32> to vector<16x128xf32>
      %33 = arith.truncf %32 : vector<16x128xf32> to vector<16x128xbf16>
      %cst_13 = arith.constant dense<0.000000e+00> : vector<16x16xf32>
      %34 = tpu.matmul %27, %33, %cst_13 {dimension_numbers = #tpu.dot_dimension_numbers<[1], [1], [0], [0], [0, 0, 1, 0], [], []>} : vector<16x128xbf16>, vector<16x128xbf16>, vector<16x16xf32> -> vector<16x16xf32>
      %c16_i32 = arith.constant 16 : i32
      %35 = arith.muli %arg6, %c16_i32 : i32
      %36 = tpu.assume_multiple %35, 8 : i32
      %37 = arith.index_cast %36 : i32 to index
      %c0_14 = arith.constant 0 : index
      %38 = vector.load %arg5[%37, %c0_14] : memref<32x16xf32, #tpu.memory_space<vmem>>, vector<16x16xf32>
      %39 = arith.addf %38, %34 : vector<16x16xf32>
      %40 = arith.index_cast %36 : i32 to index
      %c0_15 = arith.constant 0 : index
      %41 = vector.load %arg5[%40, %c0_15] : memref<32x16xf32, #tpu.memory_space<vmem>>, vector<16x16xf32>
      tpu.vector_store %arg5[%40, %c0_15], %39 {strides = array<i32>} : memref<32x16xf32, #tpu.memory_space<vmem>>, vector<16x16xf32>,
    }
    %c2_i32_7 = arith.constant 2 : i32
    %c0_i32_8 = arith.constant 0 : i32
    %11 = arith.cmpi eq, %arg1, %c0_i32_8 : i32
    %12 = arith.extui %11 : i1 to i32
    %c0_i32_9 = arith.constant 0 : i32
    %13 = arith.cmpi ne, %12, %c0_i32_9 : i32
    scf.if %13 {
      %c0_10 = arith.constant 0 : index
      %c0_11 = arith.constant 0 : index
      %14 = vector.load %arg5[%c0_10, %c0_11] : memref<32x16xf32, #tpu.memory_space<vmem>>, vector<32x16xf32>
      %15 = arith.fptosi %14 : vector<32x16xf32> to vector<32x16xi32>
      %c0_12 = arith.constant 0 : index
      %c0_13 = arith.constant 0 : index
      %c0_14 = arith.constant 0 : index
      %16 = vector.load %arg4[%c0_12, %c0_13, %c0_14] : memref<1x32x16xi32, #tpu.memory_space<vmem>>, vector<1x32x16xi32>
      %17 = vector.shape_cast %16 : vector<1x32x16xi32> to vector<32x16xi32>
      %18 = vector.shape_cast %15 : vector<32x16xi32> to vector<1x32x16xi32>
      tpu.vector_store %arg4[%c0_12, %c0_13, %c0_14], %18 {strides = array<i32>} : memref<1x32x16xi32, #tpu.memory_space<vmem>>, vector<1x32x16xi32>,
    } else {
    }
    return
  }
  func.func @transform_0(%arg0: i32, %arg1: i32) -> (i32, i32, i32) {
    %c0_i32 = arith.constant 0 : i32
    %c0_i32_0 = arith.constant 0 : i32
    return %arg0, %c0_i32, %arg1 : i32, i32, i32
  }
  func.func @transform_1(%arg0: i32, %arg1: i32) -> (i32, i32, i32) {
    %c0_i32 = arith.constant 0 : i32
    %c0_i32_0 = arith.constant 0 : i32
    return %arg0, %c0_i32, %arg1 : i32, i32, i32
  }
  func.func @transform_2(%arg0: i32, %arg1: i32) -> (i32, i32, i32) {
    %c0_i32 = arith.constant 0 : i32
    %c0_i32_0 = arith.constant 0 : i32
    %c0_i32_1 = arith.constant 0 : i32
    return %arg0, %c0_i32, %c0_i32_0 : i32, i32, i32
  }
}

</mosaic_0001>

<bundles_post_ra>
// kernel: tpu_custom_call.1
= control target key start
LH: loop header
LB: loop body
LE: loop exit
PB: predicated region body
PF: predicated region fallthrough
CT: control target
= control target key end

     0   :  { %8 = vsyncpa [#allocation4], 0  ;;  %s331_s0 = inlined_call_operand.hbm [shape: f32[2,2,128], index: 0, kind: input, shape index: {}]   ;;  %s332_s1 = inlined_call_operand.hbm [shape: s32[2,2,128], index: 1, kind: output, shape index: {0}]   ;;  %s333_s2 = inlined_call_operand.vmem [shape: s32[1,32,16], index: 2, kind: output, shape index: {1}]  }
   0x1   :  { %9 = vsyncpa [#allocation5], 0  ;;  %s14_s11 = sshll.u32 %s331_s0, 4  ;;  %s265_s12 = smov [#allocation3]   ;;  %s15_s11 = int_to_ptr.hbm [resolvable:$true] %s14_s11 }
   0x2   :  { %s16_s13 = sshll.u32 %s265_s12, 4  ;;  %s266_s14 = smov 32   ;;  %s17_s13 = int_to_ptr.vmem [resolvable:$true] %s16_s13 }
   0x3   :  { %s267_s15 = smov 2  }
   0x4   :  { %22 = dma.hbm_to_vmem [thread:$0]  %s15_s11, 64, %s17_s13, [#allocation4], %s266_s14, %s266_s14, %s267_s15  }
   0x5   :  { %257 = dma.done.wait [#allocation4], 64  }
   0x6   :  { %258 = vsyncadd [#allocation4], 4294967232  ;;  %vm32_vm0 = vcmask 130048   ;;  %v45_v0 = vlaneseq  ;;  %v268_v1 = vmov 0.0   ;;  %v37_v4 = vld [vmem:[#allocation3] sm:$0x3] }
   0x7   :  { %33 = vst.msk [vmem:[#allocation2] sm:$0xff] %vm32_vm0, %v268_v1  ;;  %v38_v5 = vld [vmem:[#allocation3 + $0x2] sm:$0x3]  ;;  %v39_v6 = vmul.f32 15.0, %v37_v4  ;;  %s296_s0 = smov 0  }
   0x8   :  { %34 = vst.msk [vmem:[#allocation2 + $0x8] sm:$0xff] %vm32_vm0, %v268_v1  ;;  %v46_v2 = vshrl.u32 %v45_v0, 7  ;;  %v40_v7 = vmul.f32 15.0, %v38_v5 }
   0x9   :  { %35 = vst.msk [vmem:[#allocation2 + $0x10] sm:$0xff] %vm32_vm0, %v268_v1  ;;  %vm156_vm1 = vcmp.lt.s32.totalorder %v39_v6, 0  ;;  %v157_v8 = vceil.f32 %v39_v6  ;;  %v158_v9 = vfloor.f32 %v39_v6 }
   0xa   :  { %36 = vst.msk [vmem:[#allocation2 + $0x18] sm:$0xff] %vm32_vm0, %v268_v1  ;;  %v47_v3 = vadd.s32 8, %v46_v2  ;;  %vm161_vm2 = vcmp.lt.s32.totalorder %v40_v7, 0  ;;  %v162_v10 = vceil.f32 %v40_v7  ;;  %v163_v11 = vfloor.f32 %v40_v7 }
   0xb   :  { %v159_v12 = vsel %vm156_vm1, %v157_v8, %v158_v9 }
   0xc   :  { %v160_v13 = vcvt.f32.s32 %v159_v12  ;;  %v164_v14 = vsel %vm161_vm2, %v162_v10, %v163_v11 }
   0xd   :  { %v165_v15 = vcvt.f32.s32 %v164_v14 }
   0xe   :  { %43 = vst [vmem:[#allocation6] sm:$0x3] %v160_v13 }
   0xf   :  { %44 = vst [vmem:[#allocation6 + $0x2] sm:$0x3] %v165_v15 }
  0x10 LB: > { %s146_s16 = sshll.u32 %s263_s0, 1  ;;  %v269_v24 = vmov 1.0|1.0   ;;  %s155_s18 = sshll.u32 %s263_s0, 4  ;;  %s263_s0 = sphi %s296_s0, %s53_s0  }
  0x11   : > { %s55_s17 = scalar_lea.vmem [#allocation3], %s146_s16  ;;  %s90_s19 = scalar_lea.vmem [#allocation2], %s155_s18 }
  0x12   : > { %v56_v16 = vld [vmem:[%s55_s17] sm:$0x3]  ;;  %v92_v28 = vld [vmem:[%s90_s19 + $0x8] sm:$0xff]  ;;  %s53_s0 = sadd.s32 1, %s263_s0  }
  0x13   : > { %v57_v17 = vmul.f32 15.0, %v56_v16  ;;  %v91_v25 = vld [vmem:[%s90_s19] sm:$0xff]  ;;  %p50_p0 = scmp.ge.s32.totalorder %s53_s0, 2  }
  0x14   :  { %s120_s22 = sshll.u32 (%p50_p0), %s332_s1, 4  ;;  %s270_s23 = smov (%p50_p0), [#allocation6]   ;;  %s121_s22 = int_to_ptr.hbm [resolvable:$true] %s120_s22 }
  0x15   : > { %vm166_vm3 = vcmp.lt.s32.totalorder %v57_v17, 0  ;;  %v167_v18 = vceil.f32 %v57_v17  ;;  %v168_v19 = vfloor.f32 %v57_v17  ;;  %s118_s24 = sshll.u32 (%p50_p0), %s270_s23, 4  ;;  %s119_s24 = int_to_ptr.vmem [resolvable:$true] %s118_s24 }
  0x16   :  { %126 = dma.vmem_to_hbm [thread:$0]  (%p50_p0), %s119_s24, 64, %s121_s22, [#allocation5], %s266_s14, %s266_s14, %s267_s15  }
  0x17   : > { %v169_v20 = vsel %vm166_vm3, %v167_v18, %v168_v19 }
  0x18   : > { %v170_v21 = vcvt.f32.s32 %v169_v20 }
  0x1a   : > { %v67_v22 = vperm.slane %v170_v21, 0  ;;  %v59_v23 = vperm.slane %v170_v21, 1 }
  0x1c   : > { %vm68_vm4 = vcmp.eq.s32.totalorder %v46_v2, %v67_v22  ;;  %vm69_vm5 = vcmp.eq.s32.totalorder %v47_v3, %v67_v22  ;;  %vm60_vm7 = vcmp.eq.s32.totalorder %v46_v2, %v59_v23  ;;  %vm61_vm8 = vcmp.eq.s32.totalorder %v47_v3, %v59_v23 }
  0x1d   : > { %vm151_vm6 = vmpackc.low %vm69_vm5, %vm68_vm4 }
  0x1e   : > { %152 = vmatpush.bf16.xpose.msk.msra.mxu0 %vm151_vm6, %v269_v24  ;;  %vm153_vm9 = vmpackc.low %vm61_vm8, %vm60_vm7 }
  0x25   : > { %154 = vmatmul.msk.bf16.vlgmr.msra.gmra.mxu0 %vm153_vm9, %v269_v24 }
  0xa2   : > { %v84_v26 = vpop.f32.mrf.mxu0 }
  0xa3   : > { %v93_v27 = vadd.f32 %v91_v25, %v84_v26 }
  0xa5   : > { %96 = vst.msk [vmem:[%s90_s19] sm:$0xff] %vm32_vm0, %v93_v27 }
  0xa9   :  { %52 = sbr.rel (!%p50_p0) target bundleno = 16 (0x10), region = 53 }
  0xaa   : > { %v86_v29 = vpop.f32.mrf.mxu0 }
  0xab   : > { %v94_v30 = vadd.f32 %v92_v28, %v86_v29 }
  0xad   : > { %97 = vst.msk [vmem:[%s90_s19 + $0x8] sm:$0xff] %vm32_vm0, %v94_v30 }
  0xb4   :  { %v101_v31 = vld [vmem:[#allocation2] sm:$0xff]  ;;  %v102_v32 = vld [vmem:[#allocation2 + $0x8] sm:$0xff]  ;;  %v103_v33 = vld [vmem:[#allocation2 + $0x10] sm:$0xff] }
  0xb5   :  { %vm171_vm10 = vcmp.lt.s32.totalorder %v101_v31, 0  ;;  %v172_v34 = vceil.f32 %v101_v31  ;;  %v173_v35 = vfloor.f32 %v101_v31  ;;  %vm176_vm11 = vcmp.lt.s32.totalorder %v102_v32, 0  ;;  %v104_v36 = vld [vmem:[#allocation2 + $0x18] sm:$0xff] }
  0xb6   :  { %v177_v37 = vceil.f32 %v102_v32  ;;  %v178_v38 = vfloor.f32 %v102_v32  ;;  %vm181_vm12 = vcmp.lt.s32.totalorder %v103_v33, 0  ;;  %v182_v39 = vceil.f32 %v103_v33 }
  0xb7   :  { %v174_v40 = vsel %vm171_vm10, %v172_v34, %v173_v35  ;;  %v183_v41 = vfloor.f32 %v103_v33  ;;  %vm186_vm13 = vcmp.lt.s32.totalorder %v104_v36, 0  ;;  %v187_v42 = vceil.f32 %v104_v36 }
  0xb8   :  { %v175_v43 = vcvt.f32.s32 %v174_v40  ;;  %v179_v44 = vsel %vm176_vm11, %v177_v37, %v178_v38  ;;  %v188_v45 = vfloor.f32 %v104_v36 }
  0xb9   :  { %v180_v46 = vcvt.f32.s32 %v179_v44  ;;  %v184_v47 = vsel %vm181_vm12, %v182_v39, %v183_v41 }
  0xba   :  { %110 = vst.msk [vmem:[%s333_s2] sm:$0xff] %vm32_vm0, %v175_v43  ;;  %v185_v48 = vcvt.f32.s32 %v184_v47  ;;  %v189_v49 = vsel %vm186_vm13, %v187_v42, %v188_v45 }
  0xbb   :  { %111 = vst.msk [vmem:[%s333_s2 + $0x8] sm:$0xff] %vm32_vm0, %v180_v46  ;;  %v190_v50 = vcvt.f32.s32 %v189_v49 }
  0xbc   :  { %112 = vst.msk [vmem:[%s333_s2 + $0x10] sm:$0xff] %vm32_vm0, %v185_v48 }
  0xbd   :  { %113 = vst.msk [vmem:[%s333_s2 + $0x18] sm:$0xff] %vm32_vm0, %v190_v50 }
  0xbe   :  { %259 = dma.done.wait [#allocation5], 64  }
  0xbf   :  { %260 = vsyncadd [#allocation5], 4294967232 }
  0xc0   :  { %135 = vsyncpa [#allocation4], 1 }
  0xc1   :  { %136 = vsyncpa [#allocation5], 1 }

</bundles_post_ra>
